<compile_context>
chip_gen: v7x
topology: tpu7x:2x2x1
jax: 0.10.0
libtpu: 0.0.40
codegen_flags: <defaults>
</compile_context>

<pallas_src>
import jax
import jax.numpy as jnp
from jax import lax
from jax.experimental import pallas as pl
from jax.experimental.pallas import tpu as pltpu


def attn_kernel(inv_ref,               # SMEM scalar (1,)
                q_in_ref, k_in_ref, v_ref,
                w1_ref, b1_ref, w2_ref, b2_ref, w3_ref,
                o_ref):
    # Scalar reciprocal of the scale factor, computed once on the scalar path.
    scale = 1.0 / inv_ref[0]

    # matmul1 / matmul2 (Linear with bias), f32 accumulation on the MXU.
    q = jnp.dot(q_in_ref[...], w1_ref[...],
                preferred_element_type=jnp.float32) + b1_ref[...]
    k = jnp.dot(k_in_ref[...], w2_ref[...],
                preferred_element_type=jnp.float32) + b2_ref[...]
    # Fold 1/inv_scale_factor into q: a [S_q, H] multiply instead of a
    # [S_q, S_k] divide on the score tile.
    q = q * scale

    # Reassociated output projection: (p @ v) @ W3 == p @ (v @ W3).
    # v @ W3 does not depend on the softmax, so the scheduler can overlap it
    # with the exp/sum EUP work instead of serializing two matmuls after softmax.
    vw3 = jnp.dot(v_ref[...], w3_ref[...], preferred_element_type=jnp.float32)

    # qk = q @ k^T without materializing k.T (contract on both last dims).
    qk = lax.dot_general(q, k,
                         dimension_numbers=(((1,), (1,)), ((), ())),
                         preferred_element_type=jnp.float32)

    # Numerically-stable softmax over the last axis; all elementwise math in f32.
    m = jnp.max(qk, axis=-1, keepdims=True)
    e = jnp.exp(qk - m)
    denom = jnp.sum(e, axis=-1, keepdims=True)
    p = e * pl.reciprocal(denom, approx=True)   # EUP vrcp slot, ~2^-12 rel. error

    # dropout -> identity (inference)

    # o = p @ (v @ W3); padded columns of W3 are zero so extra lanes store zeros.
    o_ref[...] = jnp.dot(p, vw3, preferred_element_type=jnp.float32)


def model_forward(key, value, query, mask, inv_scale_factor, params):
    """mask is accepted for signature parity with the PyTorch module (unused there too)."""
    del mask
    w1, b1, w2, b2, w3 = params
    S_q = query.shape[0]
    O = w3.shape[1]

    # Lane-dense output: pad W3's output dim up to a multiple of 128 so the final
    # store is an unmasked full-vreg store; slice back to O after the call.
    O_pad = max(128, ((O + 127) // 128) * 128)
    w3_p = jnp.zeros((w3.shape[0], O_pad), w3.dtype).at[:, :O].set(w3)

    inv = jnp.asarray(inv_scale_factor, dtype=jnp.float32).reshape((1,))

    vmem = pl.BlockSpec(memory_space=pltpu.MemorySpace.VMEM)
    out = pl.pallas_call(
        attn_kernel,
        out_shape=jax.ShapeDtypeStruct((S_q, O_pad), jnp.float32),
        in_specs=[
            pl.BlockSpec(memory_space=pltpu.MemorySpace.SMEM),  # inv_scale_factor
            vmem,  # query (S_q, D_in)
            vmem,  # key   (S_k, D_in)
            vmem,  # value (S_k, H)
            vmem,  # W1 (D_in, H)
            vmem,  # b1 (1, H)
            vmem,  # W2 (D_in, H)
            vmem,  # b2 (1, H)
            vmem,  # W3 padded (H, O_pad)
        ],
        out_specs=vmem,
    )(inv, query, key, value, w1, b1, w2, b2, w3_p)
    return out[:, :O]


def reference_forward(key, value, query, inv_scale_factor, params):
    w1, b1, w2, b2, w3 = params
    q = query @ w1 + b1
    k = key @ w2 + b2
    qk = q @ k.T
    s = qk / jnp.asarray(inv_scale_factor, jnp.float32)
    p = jax.nn.softmax(s, axis=-1)
    return (p @ value) @ w3


if __name__ == "__main__":
    # Small shapes consistent with the module's forward:
    #   query: (S_q, input_size), key: (S_k, input_size), value: (S_k, hidden_size)
    S_q, S_k = 128, 128
    input_size, hidden_size, num_layers = 32, 32, 16

    root = jax.random.PRNGKey(0)
    kq, kk, kv, kw1, kb1, kw2, kb2, kw3 = jax.random.split(root, 8)

    query = jax.random.normal(kq, (S_q, input_size), dtype=jnp.float32)
    key = jax.random.normal(kk, (S_k, input_size), dtype=jnp.float32)
    value = jax.random.normal(kv, (S_k, hidden_size), dtype=jnp.float32)
    mask = None  # unused, present only for signature parity
    inv_scale_factor = jnp.full((1,), 14000.0, dtype=jnp.float32)  # matches spec constant

    # Deterministic parameter init (Linear weights stored pre-transposed: (in, out)).
    w1 = jax.random.normal(kw1, (input_size, hidden_size), dtype=jnp.float32) * 0.1
    b1 = jax.random.normal(kb1, (1, hidden_size), dtype=jnp.float32) * 0.1
    w2 = jax.random.normal(kw2, (input_size, hidden_size), dtype=jnp.float32) * 0.1
    b2 = jax.random.normal(kb2, (1, hidden_size), dtype=jnp.float32) * 0.1
    w3 = jax.random.normal(kw3, (hidden_size, num_layers), dtype=jnp.float32) * 0.1
    params = (w1, b1, w2, b2, w3)

    out = model_forward(key, value, query, mask, inv_scale_factor, params)
    out = jax.block_until_ready(out)

    ref = reference_forward(key, value, query, inv_scale_factor, params)
    assert out.shape == (S_q, num_layers), out.shape
    # Tolerance accounts for the approx reciprocal (~2.4e-4 rel) and reassociated matmuls.
    assert jnp.allclose(out, ref, atol=1e-3, rtol=1e-3), float(jnp.max(jnp.abs(out - ref)))

    print("KERNEL_OK")
</pallas_src>

<mosaic_0001>
module attributes {stable_mosaic.version = 11 : i64} {
  func.func @attn_kernel(%arg0: memref<1xf32, #tpu.memory_space<smem>>, %arg1: memref<128x32xf32, #tpu.memory_space<vmem>>, %arg2: memref<128x32xf32, #tpu.memory_space<vmem>>, %arg3: memref<128x32xf32, #tpu.memory_space<vmem>>, %arg4: memref<32x32xf32, #tpu.memory_space<vmem>>, %arg5: memref<1x32xf32, #tpu.memory_space<vmem>>, %arg6: memref<32x32xf32, #tpu.memory_space<vmem>>, %arg7: memref<1x32xf32, #tpu.memory_space<vmem>>, %arg8: memref<32x128xf32, #tpu.memory_space<vmem>>, %arg9: memref<128x128xf32, #tpu.memory_space<vmem>>) attributes {dimension_semantics = [], scalar_prefetch = 0 : i64, scratch_operands = 0 : i64, tpu.core_type = #tpu.core_type<tc>} {
    %c0 = arith.constant 0 : index
    %0 = memref.load %arg0[%c0] : memref<1xf32, #tpu.memory_space<smem>>
    %cst = arith.constant 1.000000e+00 : f32
    %1 = arith.divf %cst, %0 : f32
    %c0_0 = arith.constant 0 : index
    %c0_1 = arith.constant 0 : index
    %2 = vector.load %arg1[%c0_0, %c0_1] : memref<128x32xf32, #tpu.memory_space<vmem>>, vector<128x32xf32>
    %c0_2 = arith.constant 0 : index
    %c0_3 = arith.constant 0 : index
    %3 = vector.load %arg4[%c0_2, %c0_3] : memref<32x32xf32, #tpu.memory_space<vmem>>, vector<32x32xf32>
    %cst_4 = arith.constant dense<0.000000e+00> : vector<128x32xf32>
    %4 = tpu.matmul %2, %3, %cst_4 {dimension_numbers = #tpu.dot_dimension_numbers<[1], [0], [0], [1], [0, 0, 1, 1], [], []>} : vector<128x32xf32>, vector<32x32xf32>, vector<128x32xf32> -> vector<128x32xf32>
    %c0_5 = arith.constant 0 : index
    %c0_6 = arith.constant 0 : index
    %5 = vector.load %arg5[%c0_5, %c0_6] : memref<1x32xf32, #tpu.memory_space<vmem>>, vector<1x32xf32>
    %6 = vector.broadcast %5 : vector<1x32xf32> to vector<128x32xf32>
    %7 = arith.addf %4, %6 : vector<128x32xf32>
    %c0_7 = arith.constant 0 : index
    %c0_8 = arith.constant 0 : index
    %8 = vector.load %arg2[%c0_7, %c0_8] : memref<128x32xf32, #tpu.memory_space<vmem>>, vector<128x32xf32>
    %c0_9 = arith.constant 0 : index
    %c0_10 = arith.constant 0 : index
    %9 = vector.load %arg6[%c0_9, %c0_10] : memref<32x32xf32, #tpu.memory_space<vmem>>, vector<32x32xf32>
    %cst_11 = arith.constant dense<0.000000e+00> : vector<128x32xf32>
    %10 = tpu.matmul %8, %9, %cst_11 {dimension_numbers = #tpu.dot_dimension_numbers<[1], [0], [0], [1], [0, 0, 1, 1], [], []>} : vector<128x32xf32>, vector<32x32xf32>, vector<128x32xf32> -> vector<128x32xf32>
    %c0_12 = arith.constant 0 : index
    %c0_13 = arith.constant 0 : index
    %11 = vector.load %arg7[%c0_12, %c0_13] : memref<1x32xf32, #tpu.memory_space<vmem>>, vector<1x32xf32>
    %12 = vector.broadcast %11 : vector<1x32xf32> to vector<128x32xf32>
    %13 = arith.addf %10, %12 : vector<128x32xf32>
    %14 = vector.broadcast %1 : f32 to vector<128x32xf32>
    %15 = arith.mulf %7, %14 : vector<128x32xf32>
    %c0_14 = arith.constant 0 : index
    %c0_15 = arith.constant 0 : index
    %16 = vector.load %arg3[%c0_14, %c0_15] : memref<128x32xf32, #tpu.memory_space<vmem>>, vector<128x32xf32>
    %c0_16 = arith.constant 0 : index
    %c0_17 = arith.constant 0 : index
    %17 = vector.load %arg8[%c0_16, %c0_17] : memref<32x128xf32, #tpu.memory_space<vmem>>, vector<32x128xf32>
    %cst_18 = arith.constant dense<0.000000e+00> : vector<128x128xf32>
    %18 = tpu.matmul %16, %17, %cst_18 {dimension_numbers = #tpu.dot_dimension_numbers<[1], [0], [0], [1], [0, 0, 1, 1], [], []>} : vector<128x32xf32>, vector<32x128xf32>, vector<128x128xf32> -> vector<128x128xf32>
    %cst_19 = arith.constant dense<0.000000e+00> : vector<128x128xf32>
    %19 = tpu.matmul %15, %13, %cst_19 {dimension_numbers = #tpu.dot_dimension_numbers<[1], [1], [0], [0], [0, 0, 1, 0], [], []>} : vector<128x32xf32>, vector<128x32xf32>, vector<128x128xf32> -> vector<128x128xf32>
    %cst_20 = arith.constant dense<0xFF800000> : vector<128xf32>
    %20 = vector.multi_reduction <maximumf>, %19, %cst_20 [1] : vector<128x128xf32> to vector<128xf32>
    %21 = vector.shape_cast %20 : vector<128xf32> to vector<128x1xf32>
    %22 = vector.broadcast %21 : vector<128x1xf32> to vector<128x128xf32>
    %23 = arith.subf %19, %22 : vector<128x128xf32>
    %24 = math.exp %23 : vector<128x128xf32>
    %cst_21 = arith.constant dense<0.000000e+00> : vector<128xf32>
    %25 = vector.multi_reduction <add>, %24, %cst_21 [1] : vector<128x128xf32> to vector<128xf32>
    %26 = vector.shape_cast %25 : vector<128xf32> to vector<128x1xf32>
    %27 = tpu.reciprocal %26 {approx = true} : vector<128x1xf32> -> vector<128x1xf32>
    %28 = vector.broadcast %27 : vector<128x1xf32> to vector<128x128xf32>
    %29 = arith.mulf %24, %28 : vector<128x128xf32>
    %cst_22 = arith.constant dense<0.000000e+00> : vector<128x128xf32>
    %30 = tpu.matmul %29, %18, %cst_22 {dimension_numbers = #tpu.dot_dimension_numbers<[1], [0], [0], [1], [0, 0, 1, 1], [], []>} : vector<128x128xf32>, vector<128x128xf32>, vector<128x128xf32> -> vector<128x128xf32>
    %c0_23 = arith.constant 0 : index
    %c0_24 = arith.constant 0 : index
    %31 = vector.load %arg9[%c0_23, %c0_24] : memref<128x128xf32, #tpu.memory_space<vmem>>, vector<128x128xf32>
    tpu.vector_store %arg9[%c0_23, %c0_24], %30 {strides = array<i32>} : memref<128x128xf32, #tpu.memory_space<vmem>>, vector<128x128xf32>,
    return
  }
}

</mosaic_0001>

<bundles_post_ra>
// kernel: tpu_custom_call.1
= control target key start
LH: loop header
LB: loop body
LE: loop exit
PB: predicated region body
PF: predicated region fallthrough
CT: control target
= control target key end

     0   :  { %vm65_vm0 = vcmask 261120   ;;  %s2436_s0 = inlined_call_operand.<no memory space> [shape: f32[1], index: 0, kind: input, shape index: {}]   ;;  %s2437_s1 = inlined_call_operand.vmem [shape: f32[128,32], index: 1, kind: input, shape index: {}]   ;;  %s2438_s2 = inlined_call_operand.vmem [shape: f32[128,32], index: 2, kind: input, shape index: {}]   ;;  %s2439_s3 = inlined_call_operand.vmem [shape: f32[128,32], index: 3, kind: input, shape index: {}]   ;;  %s2440_s4 = inlined_call_operand.vmem [shape: f32[32,32], index: 4, kind: input, shape index: {}]   ;;  %s2441_s5 = inlined_call_operand.vmem [shape: f32[1,32], index: 5, kind: input, shape index: {}]   ;;  %s2442_s6 = inlined_call_operand.vmem [shape: f32[32,32], index: 6, kind: input, shape index: {}]   ;;  %s2443_s7 = inlined_call_operand.vmem [shape: f32[1,32], index: 7, kind: input, shape index: {}]   ;;  %s2444_s8 = inlined_call_operand.vmem [shape: f32[32,128], index: 8, kind: input, shape index: {}]   ;;  %s2445_s9 = inlined_call_operand.hbm [shape: f32[128,128], index: 9, kind: output, shape index: {}]  }
   0x1   :  { %v275_v0 = vld [vmem:[%s2442_s6] sm:$0xff]  ;;  %v276_v1 = vld [vmem:[%s2442_s6 + $0x8] sm:$0xff]  ;;  %v277_v2 = vld [vmem:[%s2442_s6 + $0x10] sm:$0xff] }
   0x2   :  { %v1693_v3 = vpack.c.bf16 %v276_v1, %v275_v0  ;;  %v278_v4 = vld [vmem:[%s2442_s6 + $0x18] sm:$0xff]  ;;  %v259_v5 = vld [vmem:[%s2438_s2] sm:$0xff]  ;;  %v55_v8 = vld [vmem:[%s2440_s4 + $0x8] sm:$0xff] }
   0x3   :  { %v1697_v6 = vpack.c.bf16 %v278_v4, %v277_v2  ;;  %1517 = vmatprep.mubr.msk.f32.mxu1 %vm65_vm0, %v259_v5  ;;  %v54_v7 = vld [vmem:[%s2440_s4] sm:$0xff]  ;;  %v56_v10 = vld [vmem:[%s2440_s4 + $0x10] sm:$0xff]  ;;  %v57_v11 = vld [vmem:[%s2440_s4 + $0x18] sm:$0xff] }
   0x4   :  { %1694 = vmatprep.subr.bf16.mxu1 %v1693_v3  ;;  %v1685_v9 = vpack.c.bf16 %v55_v8, %v54_v7  ;;  %v1689_v12 = vpack.c.bf16 %v57_v11, %v56_v10  ;;  %v38_v13 = vld [vmem:[%s2437_s1] sm:$0xff]  ;;  %v260_v14 = vld [vmem:[%s2438_s2 + $0x8] sm:$0xff]  ;;  %v261_v15 = vld [vmem:[%s2438_s2 + $0x10] sm:$0xff] }
   0x5   :  { %1696 = vmatpush3.bf16.msra.mxu1 %v1693_v3  ;;  %1485 = vmatprep.mubr.msk.f32.mxu0 %vm65_vm0, %v38_v13  ;;  %v262_v16 = vld [vmem:[%s2438_s2 + $0x18] sm:$0xff]  ;;  %v39_v17 = vld [vmem:[%s2437_s1 + $0x8] sm:$0xff]  ;;  %v263_v18 = vld [vmem:[%s2438_s2 + $0x20] sm:$0xff] }
   0x6   :  { %1698 = vmatprep.subr.bf16.mxu1 %v1697_v6  ;;  %1686 = vmatprep.subr.bf16.mxu0 %v1685_v9  ;;  %v40_v19 = vld [vmem:[%s2437_s1 + $0x10] sm:$0xff] }
   0x7   :  { %1688 = vmatpush3.bf16.msra.mxu0 %v1685_v9 }
   0x8   :  { %1690 = vmatprep.subr.bf16.mxu0 %v1689_v12 }
   0x9   :  { %1700 = vmatpush3.bf16.msra.mxu1 %v1697_v6 }
   0xb   :  { %1692 = vmatpush3.bf16.msra.mxu0 %v1689_v12 }
   0xc   :  { %1518 = vmatmul.mubr.msk.f32.vlgmr.msra.gmra.mrb[0].mxu1 %vm65_vm0, %v260_v14 }
   0xd   :  { %1520 = vmatprep.mubr.msk.f32.mxu1 %vm65_vm0, %v261_v15 }
   0xe   :  { %15 = vsyncpa [#allocation4], 0  ;;  %1486 = vmatmul.mubr.msk.f32.vlgmr.msra.gmra.mrb[0].mxu0 %vm65_vm0, %v39_v17  ;;  %v264_v20 = vld [vmem:[%s2438_s2 + $0x28] sm:$0xff]  ;;  %v41_v21 = vld [vmem:[%s2437_s1 + $0x18] sm:$0xff]  ;;  %v35_v44 = vstv %s2436_s0 }
   0xf   :  { %1488 = vmatprep.mubr.msk.f32.mxu0 %vm65_vm0, %v40_v19  ;;  %v265_v22 = vld [vmem:[%s2438_s2 + $0x30] sm:$0xff]  ;;  %v42_v23 = vld [vmem:[%s2437_s1 + $0x20] sm:$0xff]  ;;  %v266_v24 = vld [vmem:[%s2438_s2 + $0x38] sm:$0xff]  ;;  %1794 = vrcp.f32 %v35_v44 }
  0x10   :  { %1521 = vmatmul.mubr.msk.f32.gmra.mrb[2].mxu1 %vm65_vm0, %v262_v16  ;;  %v43_v25 = vld [vmem:[%s2437_s1 + $0x28] sm:$0xff]  ;;  %v267_v26 = vld [vmem:[%s2438_s2 + $0x40] sm:$0xff]  ;;  %v44_v27 = vld [vmem:[%s2437_s1 + $0x30] sm:$0xff] }
  0x11   :  { %1523 = vmatprep.mubr.msk.f32.mxu1 %vm65_vm0, %v263_v18  ;;  %v268_v28 = vld [vmem:[%s2438_s2 + $0x48] sm:$0xff]  ;;  %v45_v29 = vld [vmem:[%s2437_s1 + $0x38] sm:$0xff]  ;;  %v269_v30 = vld [vmem:[%s2438_s2 + $0x50] sm:$0xff] }
  0x12   :  { %1489 = vmatmul.mubr.msk.f32.gmra.mrb[2].mxu0 %vm65_vm0, %v41_v21  ;;  %v46_v31 = vld [vmem:[%s2437_s1 + $0x40] sm:$0xff]  ;;  %v270_v32 = vld [vmem:[%s2438_s2 + $0x58] sm:$0xff]  ;;  %v47_v33 = vld [vmem:[%s2437_s1 + $0x48] sm:$0xff] }
  0x13   :  { %1491 = vmatprep.mubr.msk.f32.mxu0 %vm65_vm0, %v42_v23  ;;  %v271_v34 = vld [vmem:[%s2438_s2 + $0x60] sm:$0xff]  ;;  %v48_v35 = vld [vmem:[%s2437_s1 + $0x50] sm:$0xff]  ;;  %v272_v36 = vld [vmem:[%s2438_s2 + $0x68] sm:$0xff] }
  0x14   :  { %1524 = vmatmul.mubr.msk.f32.gmra.mrb[4].mxu1 %vm65_vm0, %v264_v20  ;;  %v49_v37 = vld [vmem:[%s2437_s1 + $0x58] sm:$0xff]  ;;  %v273_v38 = vld [vmem:[%s2438_s2 + $0x70] sm:$0xff]  ;;  %v50_v39 = vld [vmem:[%s2437_s1 + $0x60] sm:$0xff] }
  0x15   :  { %1526 = vmatprep.mubr.msk.f32.mxu1 %vm65_vm0, %v265_v22  ;;  %v274_v40 = vld [vmem:[%s2438_s2 + $0x78] sm:$0xff]  ;;  %v51_v41 = vld [vmem:[%s2437_s1 + $0x68] sm:$0xff]  ;;  %v52_v42 = vld [vmem:[%s2437_s1 + $0x70] sm:$0xff] }
  0x16   :  { %1492 = vmatmul.mubr.msk.f32.gmra.mrb[4].mxu0 %vm65_vm0, %v43_v25  ;;  %v53_v43 = vld [vmem:[%s2437_s1 + $0x78] sm:$0xff]  ;;  %v2095_v46 = vld [vmem:[%s2443_s7] ss:$0 sm:$0xff]  ;;  %vm2101_vm1 = vmpackc.low %vm65_vm0, %vm65_vm0 }
  0x17   :  { %1494 = vmatprep.mubr.msk.f32.mxu0 %vm65_vm0, %v44_v27  ;;  %v2108_v52 = vld [vmem:[%s2441_s5] ss:$0 sm:$0xff] }
  0x18   :  { %1527 = vmatmul.mubr.msk.f32.gmra.mrb[6].mxu1 %vm65_vm0, %v266_v24  ;;  %v512_v51 = vld [vmem:[%s2444_s8] sm:$0xff] }
  0x19   :  { %1529 = vmatprep.mubr.msk.f32.mxu1 %vm65_vm0, %v267_v26  ;;  %v1795_v45 = vpop.eup %1794 }
  0x1a   :  { %1495 = vmatmul.mubr.msk.f32.gmra.mrb[6].mxu0 %vm65_vm0, %v45_v29  ;;  %1789 = vpush %v1795_v45 }
  0x1b   :  { %1497 = vmatprep.mubr.msk.f32.mxu0 %vm65_vm0, %v46_v31 }
  0x1c   :  { %1530 = vmatmul.mubr.msk.f32.gmra.mrb[8].mxu1 %vm65_vm0, %v268_v28 }
  0x1d   :  { %1532 = vmatprep.mubr.msk.f32.mxu1 %vm65_vm0, %v269_v30 }
  0x1e   :  { %1498 = vmatmul.mubr.msk.f32.gmra.mrb[8].mxu0 %vm65_vm0, %v47_v33 }
  0x1f   :  { %1500 = vmatprep.mubr.msk.f32.mxu0 %vm65_vm0, %v48_v35 }
  0x20   :  { %1533 = vmatmul.mubr.msk.f32.gmra.mrb[10].mxu1 %vm65_vm0, %v270_v32 }
  0x21   :  { %1535 = vmatprep.mubr.msk.f32.mxu1 %vm65_vm0, %v271_v34 }
  0x22   :  { %1501 = vmatmul.mubr.msk.f32.gmra.mrb[10].mxu0 %vm65_vm0, %v49_v37 }
  0x23   :  { %1503 = vmatprep.mubr.msk.f32.mxu0 %vm65_vm0, %v50_v39 }
  0x24   :  { %1536 = vmatmul.mubr.msk.f32.gmra.mrb[12].mxu1 %vm65_vm0, %v272_v36 }
  0x25   :  { %1538 = vmatprep.mubr.msk.f32.mxu1 %vm65_vm0, %v273_v38 }
  0x26   :  { %1504 = vmatmul.mubr.msk.f32.gmra.mrb[12].mxu0 %vm65_vm0, %v51_v41 }
  0x27   :  { %1506 = vmatprep.mubr.msk.f32.mxu0 %vm65_vm0, %v52_v42 }
  0x28   :  { %1539 = vmatmul.mubr.msk.f32.gmra.mrb[14].mxu1 %vm65_vm0, %v274_v40 }
  0x2a   :  { %1507 = vmatmul.mubr.msk.f32.gmra.mrb[14].mxu0 %vm65_vm0, %v53_v43 }
  0x4b   :  { %s1790_s1 = spop %1789 }
  0x4c   :  { %v2113_v59 = vstv %s1790_s1 }
  0xdf   :  { %v1519_v47 = vpop.f32.mrb[0].mxu1 }
  0xe0   :  { %v406_v48 = vadd.f32 %v1519_v47, %v2095_v46  ;;  %v400_v49 = vpop.f32.mrb[1].mxu1 }
  0xe1   :  { %v401_v50 = vadd.f32 %v2095_v46, %v400_v49  ;;  %v2110_v55 = vpop.f32.mrb[0].mxu0 }
  0xe2   :  { %v180_v58 = vpop.f32.mrb[1].mxu0 }
  0xe3   :  { %v1709_v53 = vpack.c.bf16 %v406_v48, %v401_v50  ;;  %v1522_v54 = vpop.f32.mrb[2].mxu1  ;;  %v181_v61 = vadd.f32 %v2108_v52, %v180_v58 }
  0xe4   :  { %v416_v56 = vadd.f32 %v1522_v54, %v2095_v46  ;;  %v410_v57 = vpop.f32.mrb[3].mxu1 }
  0xe5   :  { %1711 = vmatprep.subr.msk.bf16.mxu1 %vm2101_vm1, %v1709_v53  ;;  %v411_v60 = vadd.f32 %v2095_v46, %v410_v57  ;;  %v1490_v0 = vpop.f32.mrb[2].mxu0  ;;  %v480_v1 = vmul.f32 %v2113_v59, %v181_v61 }
  0xe6   :  { %1714 = vmatpush3.bf16.xpose.msk.msra.mxu1 %vm2101_vm1, %v1709_v53  ;;  %v196_v4 = vadd.f32 %v1490_v0, %v2108_v52  ;;  %v2124_v5 = vpop.f32.mrb[3].mxu0 }
  0xe7   :  { %v1715_v62 = vpack.c.bf16 %v416_v56, %v411_v60  ;;  %v1525_v63 = vpop.f32.mrb[4].mxu1  ;;  %1605 = vmatprep.mubr.msk.f32.mxu1 %vm65_vm0, %v480_v1 }
  0xe8   :  { %v426_v2 = vadd.f32 %v1525_v63, %v2095_v46  ;;  %v420_v3 = vpop.f32.mrb[5].mxu1  ;;  %v2131_v7 = vmul.f32 %v2113_v59, %v196_v4 }
  0xe9   :  { %1717 = vmatprep.subr.msk.bf16.mxu1 %vm2101_vm1, %v1715_v62  ;;  %v421_v6 = vadd.f32 %v2095_v46, %v420_v3  ;;  %v1493_v10 = vpop.f32.mrb[4].mxu0 }
  0xea   :  { %v206_v13 = vadd.f32 %v1493_v10, %v2108_v52  ;;  %v200_v14 = vpop.f32.mrb[5].mxu0 }
  0xeb   :  { %v1721_v8 = vpack.c.bf16 %v426_v2, %v421_v6  ;;  %v1528_v9 = vpop.f32.mrb[6].mxu1  ;;  %v201_v16 = vadd.f32 %v2108_v52, %v200_v14 }
  0xec   :  { %v436_v11 = vadd.f32 %v1528_v9, %v2095_v46  ;;  %v430_v12 = vpop.f32.mrb[7].mxu1  ;;  %v2140_v17 = vmul.f32 %v2113_v59, %v206_v13  ;;  %v191_v13 = vadd.f32 %v2108_v52, %v2124_v5  ;;  %v515_v5 = vld [vmem:[%s2444_s8 + $0x18] sm:$0xff] }
  0xed   :  { %v431_v15 = vadd.f32 %v2095_v46, %v430_v12  ;;  %v1496_v20 = vpop.f32.mrb[6].mxu0  ;;  %v2145_v21 = vmul.f32 %v2113_v59, %v201_v16  ;;  %v186_v12 = vadd.f32 %v2110_v55, %v2108_v52  ;;  %v514_v55 = vld [vmem:[%s2444_s8 + $0x10] sm:$0xff] }
  0xee   :  { %1720 = vmatpush3.bf16.xpose.msk.msra.mxu1 %vm2101_vm1, %v1715_v62  ;;  %v216_v24 = vadd.f32 %v1496_v20, %v2108_v52  ;;  %v210_v25 = vpop.f32.mrb[7].mxu0  ;;  %v1705_v16 = vpack.c.bf16 %v515_v5, %v514_v55  ;;  %v500_v20 = vld [vmem:[%s2439_s3 + $0x20] sm:$0xff] }
  0xef   :  { %1723 = vmatprep.subr.msk.bf16.mxu1 %vm2101_vm1, %v1721_v8  ;;  %v1727_v18 = vpack.c.bf16 %v436_v11, %v431_v15  ;;  %v1531_v19 = vpop.f32.mrb[8].mxu1  ;;  %v211_v27 = vadd.f32 %v2108_v52, %v210_v25  ;;  %v481_v14 = vmul.f32 %v2113_v59, %v186_v12  ;;  %v482_v15 = vmul.f32 %v2113_v59, %v191_v13  ;;  %v505_v25 = vld [vmem:[%s2439_s3 + $0x48] sm:$0xff] }
  0xf0   :  { %v446_v22 = vadd.f32 %v1531_v19, %v2095_v46  ;;  %v440_v23 = vpop.f32.mrb[9].mxu1  ;;  %v2152_v28 = vmul.f32 %v2113_v59, %v216_v24  ;;  %v499_v19 = vld [vmem:[%s2439_s3 + $0x18] sm:$0xff]  ;;  %v504_v24 = vld [vmem:[%s2439_s3 + $0x40] sm:$0xff] }
  0xf1   :  { %v441_v26 = vadd.f32 %v2095_v46, %v440_v23  ;;  %v1499_v31 = vpop.f32.mrb[8].mxu0  ;;  %v486_v32 = vmul.f32 %v2113_v59, %v211_v27  ;;  %v503_v23 = vld [vmem:[%s2439_s3 + $0x38] sm:$0xff] }
  0xf2   :  { %v226_v35 = vadd.f32 %v1499_v31, %v2108_v52  ;;  %v220_v36 = vpop.f32.mrb[9].mxu0  ;;  %v507_v27 = vld [vmem:[%s2439_s3 + $0x58] sm:$0xff] }
  0xf3   :  { %v1733_v29 = vpack.c.bf16 %v446_v22, %v441_v26  ;;  %v1534_v30 = vpop.f32.mrb[10].mxu1  ;;  %v221_v38 = vadd.f32 %v2108_v52, %v220_v36  ;;  %v502_v22 = vld [vmem:[%s2439_s3 + $0x30] sm:$0xff]  ;;  %v511_v31 = vld [vmem:[%s2439_s3 + $0x78] sm:$0xff] }
  0xf4   :  { %v456_v33 = vadd.f32 %v1534_v30, %v2095_v46  ;;  %v450_v34 = vpop.f32.mrb[11].mxu1  ;;  %v489_v39 = vmul.f32 %v2113_v59, %v226_v35  ;;  %v506_v26 = vld [vmem:[%s2439_s3 + $0x50] sm:$0xff] }
  0xf5   :  { %v451_v37 = vadd.f32 %v2095_v46, %v450_v34  ;;  %v1502_v42 = vpop.f32.mrb[10].mxu0  ;;  %v488_v43 = vmul.f32 %v2113_v59, %v221_v38  ;;  %v510_v30 = vld [vmem:[%s2439_s3 + $0x70] sm:$0xff] }
  0xf6   :  { %1726 = vmatpush3.bf16.xpose.msk.msra.mxu1 %vm2101_vm1, %v1721_v8  ;;  %v236_v47 = vadd.f32 %v1502_v42, %v2108_v52  ;;  %v230_v48 = vpop.f32.mrb[11].mxu0 }
  0xf7   :  { %1729 = vmatprep.subr.msk.bf16.mxu1 %vm2101_vm1, %v1727_v18  ;;  %v1739_v40 = vpack.c.bf16 %v456_v33, %v451_v37  ;;  %v1537_v41 = vpop.f32.mrb[12].mxu1  ;;  %v231_v50 = vadd.f32 %v2108_v52, %v230_v48 }
  0xf8   :  { %v466_v44 = vadd.f32 %v1537_v41, %v2095_v46  ;;  %v460_v45 = vpop.f32.mrb[13].mxu1  ;;  %v491_v53 = vmul.f32 %v2113_v59, %v236_v47 }
  0xf9   :  { %v461_v49 = vadd.f32 %v2095_v46, %v460_v45  ;;  %v1505_v57 = vpop.f32.mrb[12].mxu0  ;;  %v490_v58 = vmul.f32 %v2113_v59, %v231_v50 }
  0xfa   :  { %v246_v62 = vadd.f32 %v1505_v57, %v2108_v52  ;;  %v240_v63 = vpop.f32.mrb[13].mxu0 }
  0xfb   :  { %v1745_v54 = vpack.c.bf16 %v466_v44, %v461_v49  ;;  %v1540_v56 = vpop.f32.mrb[14].mxu1  ;;  %v241_v1 = vadd.f32 %v2108_v52, %v240_v63 }
  0xfc   :  { %v476_v60 = vadd.f32 %v1540_v56, %v2095_v46  ;;  %v470_v61 = vpop.f32.mrb[15].mxu1  ;;  %v493_v2 = vmul.f32 %v2113_v59, %v246_v62 }
  0xfd   :  { %v471_v0 = vadd.f32 %v2095_v46, %v470_v61  ;;  %v1508_v4 = vpop.f32.mrb[14].mxu0  ;;  %v492_v6 = vmul.f32 %v2113_v59, %v241_v1 }
  0xfe   :  { %1732 = vmatpush3.bf16.xpose.msk.msra.mxu1 %vm2101_vm1, %v1727_v18  ;;  %v256_v8 = vadd.f32 %v1508_v4, %v2108_v52  ;;  %v250_v9 = vpop.f32.mrb[15].mxu0  ;;  %v498_v18 = vld [vmem:[%s2439_s3 + $0x10] sm:$0xff] }
  0xff   :  { %1735 = vmatprep.subr.msk.bf16.mxu1 %vm2101_vm1, %v1733_v29  ;;  %v1751_v3 = vpack.c.bf16 %v476_v60, %v471_v0  ;;  %v251_v10 = vadd.f32 %v2108_v52, %v250_v9  ;;  %v513_v52 = vld [vmem:[%s2444_s8 + $0x8] sm:$0xff] }
 0x100   :  { %v495_v46 = vmul.f32 %v2113_v59, %v256_v8 }
 0x101   :  { %v494_v11 = vmul.f32 %v2113_v59, %v251_v10  ;;  %v1701_v59 = vpack.c.bf16 %v513_v52, %v512_v51 }
 0x103   :  { %1702 = vmatprep.subr.bf16.mxu0 %v1701_v59 }
 0x104   :  { %1704 = vmatpush3.bf16.msra.mxu0 %v1701_v59 }
 0x105   :  { %1706 = vmatprep.subr.bf16.mxu0 %v1705_v16 }
 0x106   :  { %1738 = vmatpush3.bf16.xpose.msk.msra.mxu1 %vm2101_vm1, %v1733_v29  ;;  %v509_v29 = vld [vmem:[%s2439_s3 + $0x68] sm:$0xff] }
 0x107   :  { %1741 = vmatprep.subr.msk.bf16.mxu1 %vm2101_vm1, %v1739_v40 }
 0x108   :  { %1708 = vmatpush3.bf16.msra.mxu0 %v1705_v16 }
 0x10e   :  { %1744 = vmatpush3.bf16.xpose.msk.msra.mxu1 %vm2101_vm1, %v1739_v40 }
 0x10f   :  { %1747 = vmatprep.subr.msk.bf16.mxu1 %vm2101_vm1, %v1745_v54 }
 0x116   :  { %1750 = vmatpush3.bf16.xpose.msk.msra.mxu1 %vm2101_vm1, %v1745_v54 }
 0x117   :  { %1753 = vmatprep.subr.msk.bf16.mxu1 %vm2101_vm1, %v1751_v3 }
 0x11e   :  { %1756 = vmatpush3.bf16.xpose.msk.msra.mxu1 %vm2101_vm1, %v1751_v3 }
 0x125   :  { %1606 = vmatmul.mubr.msk.f32.vlgmr.msra.gmra.mrb[16].mxu1 %vm65_vm0, %v481_v14 }
 0x126   :  { %1608 = vmatprep.mubr.msk.f32.mxu1 %vm65_vm0, %v482_v15 }
 0x129   :  { %1609 = vmatmul.mubr.msk.f32.gmra.mrb[18].mxu1 %vm65_vm0, %v2131_v7  ;;  %v496_v7 = vld [vmem:[%s2439_s3] sm:$0xff] }
 0x12a   :  { %1611 = vmatprep.mubr.msk.f32.mxu1 %vm65_vm0, %v2145_v21  ;;  %1549 = vmatprep.mubr.msk.f32.mxu0 %vm65_vm0, %v496_v7  ;;  %v501_v21 = vld [vmem:[%s2439_s3 + $0x28] sm:$0xff] }
 0x12d   :  { %1612 = vmatmul.mubr.msk.f32.gmra.mrb[20].mxu1 %vm65_vm0, %v2140_v17  ;;  %v497_v17 = vld [vmem:[%s2439_s3 + $0x8] sm:$0xff] }
 0x12e   :  { %1614 = vmatprep.mubr.msk.f32.mxu1 %vm65_vm0, %v486_v32  ;;  %1550 = vmatmul.mubr.msk.f32.vlgmr.msra.gmra.mrb[16].mxu0 %vm65_vm0, %v497_v17 }
 0x12f   :  { %1552 = vmatprep.mubr.msk.f32.mxu0 %vm65_vm0, %v498_v18 }
 0x131   :  { %1615 = vmatmul.mubr.msk.f32.gmra.mrb[22].mxu1 %vm65_vm0, %v2152_v28  ;;  %v508_v28 = vld [vmem:[%s2439_s3 + $0x60] sm:$0xff]  ;;  %s1884_s3 = smov [#allocation3]  }
 0x132   :  { %1617 = vmatprep.mubr.msk.f32.mxu1 %vm65_vm0, %v488_v43  ;;  %1553 = vmatmul.mubr.msk.f32.gmra.mrb[18].mxu0 %vm65_vm0, %v499_v19  ;;  %s1260_s4 = sshll.u32 %s1884_s3, 4  ;;  %s1261_s4 = int_to_ptr.vmem [resolvable:$true] %s1260_s4 }
 0x133   :  { %1555 = vmatprep.mubr.msk.f32.mxu0 %vm65_vm0, %v500_v20  ;;  %s1860_s11 = scalar_lea.vmem %s1261_s4, 2048  ;;  %p1865_p1 = scmp.lt.s32.totalorder %s1261_s4, %s1261_s4 }
 0x134   :  { %p1861_p0 = scmp.ne.s32.totalorder %s1261_s4, %s1860_s11  ;;  %p1866_p2 = scmp.lt.s32.totalorder %s1860_s11, %s1860_s11 }
 0x135   :  { %1618 = vmatmul.mubr.msk.f32.gmra.mrb[24].mxu1 %vm65_vm0, %v489_v39 }
 0x136   :  { %1620 = vmatprep.mubr.msk.f32.mxu1 %vm65_vm0, %v490_v58  ;;  %1556 = vmatmul.mubr.msk.f32.gmra.mrb[20].mxu0 %vm65_vm0, %v501_v21  ;;  %p1867_p3 = por %p1866_p2, %p1865_p1 }
 0x137   :  { %1558 = vmatprep.mubr.msk.f32.mxu0 %vm65_vm0, %v502_v22 }
 0x138   :  { %p1868_p4 = pnand %p1867_p3, %p1861_p0 }
 0x139   :  { %1621 = vmatmul.mubr.msk.f32.gmra.mrb[26].mxu1 %vm65_vm0, %v491_v53 }
 0x13a   :  { %1623 = vmatprep.mubr.msk.f32.mxu1 %vm65_vm0, %v492_v6  ;;  %1559 = vmatmul.mubr.msk.f32.gmra.mrb[22].mxu0 %vm65_vm0, %v503_v23 }
 0x13b   :  { %1561 = vmatprep.mubr.msk.f32.mxu0 %vm65_vm0, %v504_v24 }
 0x13d   :  { %1624 = vmatmul.mubr.msk.f32.gmra.mrb[28].mxu1 %vm65_vm0, %v493_v2 }
 0x13e   :  { %1626 = vmatprep.mubr.msk.f32.mxu1 %vm65_vm0, %v494_v11  ;;  %1562 = vmatmul.mubr.msk.f32.gmra.mrb[24].mxu0 %vm65_vm0, %v505_v25 }
 0x13f   :  { %1564 = vmatprep.mubr.msk.f32.mxu0 %vm65_vm0, %v506_v26 }
 0x141   :  { %1627 = vmatmul.mubr.msk.f32.gmra.mrb[30].mxu1 %vm65_vm0, %v495_v46 }
 0x142   :  { %1565 = vmatmul.mubr.msk.f32.gmra.mrb[26].mxu0 %vm65_vm0, %v507_v27 }
 0x143   :  { %1567 = vmatprep.mubr.msk.f32.mxu0 %vm65_vm0, %v508_v28 }
 0x146   :  { %1568 = vmatmul.mubr.msk.f32.gmra.mrb[28].mxu0 %vm65_vm0, %v509_v29 }
 0x147   :  { %1570 = vmatprep.mubr.msk.f32.mxu0 %vm65_vm0, %v510_v30 }
 0x14a   :  { %1571 = vmatmul.mubr.msk.f32.gmra.mrb[30].mxu0 %vm65_vm0, %v511_v31 }
 0x1f8   :  { %v2300_v32 = vpop.f32.mrb[16].mxu1 }
 0x1f9   :  { %v871_v33 = vpop.f32.mrb[17].mxu1 }
 0x1fa   :  { %950 = vmax.xlane.f32.xlu0 %v871_v33 }
 0x1fc   :  { %v2302_v34 = vpop.f32.mrb[18].mxu1 }
 0x1fd   :  { %v2304_v35 = vpop.f32.mrb[19].mxu1 }
 0x1fe   :  { %952 = vmax.xlane.f32.xlu0 %v2300_v32  ;;  %954 = vmax.xlane.f32.xlu1 %v2304_v35 }
 0x200   :  { %v2308_v36 = vpop.f32.mrb[20].mxu1 }
 0x201   :  { %v2310_v37 = vpop.f32.mrb[21].mxu1  ;;  %v1551_v49 = vpop.f32.mrb[16].mxu0 }
 0x202   :  { %956 = vmax.xlane.f32.xlu1 %v2302_v34  ;;  %958 = vmax.xlane.f32.xlu0 %v2310_v37  ;;  %v630_v50 = vpop.f32.mrb[17].mxu0 }
 0x203   :  { %v1757_v53 = vpack.c.bf16 %v1551_v49, %v630_v50 }
 0x204   :  { %v2314_v38 = vpop.f32.mrb[22].mxu1 }
 0x205   :  { %v2316_v39 = vpop.f32.mrb[23].mxu1  ;;  %v1554_v54 = vpop.f32.mrb[18].mxu0  ;;  %1758 = vmatprep.subr.bf16.mxu0 %v1757_v53 }
 0x206   :  { %960 = vmax.xlane.f32.xlu1 %v2308_v36  ;;  %962 = vmax.xlane.f32.xlu0 %v2316_v39  ;;  %v640_v56 = vpop.f32.mrb[19].mxu0 }
 0x207   :  { %1760 = vmatpush3.bf16.msra.mxu0 %v1757_v53  ;;  %v1761_v57 = vpack.c.bf16 %v1554_v54, %v640_v56 }
 0x208   :  { %v2320_v40 = vpop.f32.mrb[24].mxu1 }
 0x209   :  { %v2322_v41 = vpop.f32.mrb[25].mxu1  ;;  %v1557_v58 = vpop.f32.mrb[20].mxu0  ;;  %1762 = vmatprep.subr.bf16.mxu0 %v1761_v57 }
 0x20a   :  { %964 = vmax.xlane.f32.xlu1 %v2314_v38  ;;  %966 = vmax.xlane.f32.xlu0 %v2322_v41  ;;  %v650_v60 = vpop.f32.mrb[21].mxu0 }
 0x20b   :  { %1764 = vmatpush3.bf16.msra.mxu0 %v1761_v57  ;;  %v1765_v61 = vpack.c.bf16 %v1557_v58, %v650_v60 }
 0x20c   :  { %v2326_v42 = vpop.f32.mrb[26].mxu1 }
 0x20d   :  { %v2328_v43 = vpop.f32.mrb[27].mxu1  ;;  %v1560_v62 = vpop.f32.mrb[22].mxu0  ;;  %1766 = vmatprep.subr.bf16.mxu0 %v1765_v61 }
 0x20e   :  { %968 = vmax.xlane.f32.xlu1 %v2320_v40  ;;  %970 = vmax.xlane.f32.xlu0 %v2328_v43  ;;  %v660_v63 = vpop.f32.mrb[23].mxu0 }
 0x20f   :  { %1768 = vmatpush3.bf16.msra.mxu0 %v1765_v61  ;;  %v1769_v0 = vpack.c.bf16 %v1560_v62, %v660_v63 }
 0x210   :  { %v2332_v44 = vpop.f32.mrb[28].mxu1 }
 0x211   :  { %v2334_v45 = vpop.f32.mrb[29].mxu1  ;;  %v1563_v3 = vpop.f32.mrb[24].mxu0  ;;  %1770 = vmatprep.subr.bf16.mxu0 %v1769_v0 }
 0x212   :  { %972 = vmax.xlane.f32.xlu1 %v2326_v42  ;;  %974 = vmax.xlane.f32.xlu0 %v2334_v45  ;;  %v670_v4 = vpop.f32.mrb[25].mxu0 }
 0x213   :  { %1772 = vmatpush3.bf16.msra.mxu0 %v1769_v0  ;;  %v1773_v8 = vpack.c.bf16 %v1563_v3, %v670_v4 }
 0x214   :  { %v2338_v47 = vpop.f32.mrb[30].mxu1 }
 0x215   :  { %v2340_v48 = vpop.f32.mrb[31].mxu1  ;;  %v1566_v12 = vpop.f32.mrb[26].mxu0  ;;  %1774 = vmatprep.subr.bf16.mxu0 %v1773_v8 }
 0x216   :  { %976 = vmax.xlane.f32.xlu1 %v2332_v44  ;;  %978 = vmax.xlane.f32.xlu0 %v2340_v48  ;;  %v680_v13 = vpop.f32.mrb[27].mxu0 }
 0x217   :  { %1776 = vmatpush3.bf16.msra.mxu0 %v1773_v8  ;;  %v1777_v51 = vpack.c.bf16 %v1566_v12, %v680_v13 }
 0x219   :  { %1778 = vmatprep.subr.bf16.mxu0 %v1777_v51 }
 0x21a   :  { %980 = vmax.xlane.f32.xlu1 %v2338_v47 }
 0x21b   :  { %1780 = vmatpush3.bf16.msra.mxu0 %v1777_v51 }
 0x287   :  { %v951_v1 = vpop.xlane.xlu0 %950 }
 0x288   :  { %v982_v2 = vsub.f32 %v871_v33, %v951_v1 }
 0x28a   :  { %v998_v6 = vmul.f32 1.442695, %v982_v2 }
 0x28b   :  { %v953_v9 = vpop.xlane.xlu0 %952  ;;  %v955_v10 = vpop.xlane.xlu1 %954 }
 0x28c   :  { %1796 = vpow2.f32 %v998_v6  ;;  %v983_v46 = vsub.f32 %v2300_v32, %v953_v9  ;;  %v984_v11 = vsub.f32 %v2304_v35, %v955_v10 }
 0x28e   :  { %v1000_v14 = vmul.f32 1.442695, %v983_v46  ;;  %v1002_v15 = vmul.f32 1.442695, %v984_v11 }
 0x28f   :  { %v957_v52 = vpop.xlane.xlu1 %956  ;;  %v959_v55 = vpop.xlane.xlu0 %958 }
 0x290   :  { %1798 = vpow2.f32 %v1000_v14  ;;  %v985_v59 = vsub.f32 %v2302_v34, %v957_v52  ;;  %v986_v5 = vsub.f32 %v2310_v37, %v959_v55 }
 0x291   :  { %1800 = vpow2.f32 %v1002_v15 }
 0x292   :  { %v1004_v7 = vmul.f32 1.442695, %v985_v59  ;;  %v1006_v16 = vmul.f32 1.442695, %v986_v5 }
 0x293   :  { %v961_v17 = vpop.xlane.xlu1 %960  ;;  %v963_v18 = vpop.xlane.xlu0 %962 }
 0x294   :  { %1802 = vpow2.f32 %v1004_v7  ;;  %v987_v19 = vsub.f32 %v2308_v36, %v961_v17  ;;  %v988_v20 = vsub.f32 %v2316_v39, %v963_v18 }
 0x295   :  { %1804 = vpow2.f32 %v1006_v16 }
 0x296   :  { %v2351_v21 = vpop.eup %1796  ;;  %v1008_v22 = vmul.f32 1.442695, %v987_v19  ;;  %v1010_v23 = vmul.f32 1.442695, %v988_v20 }
 0x297   :  { %v965_v24 = vpop.xlane.xlu1 %964  ;;  %v967_v25 = vpop.xlane.xlu0 %966  ;;  %1030 = vadd.xlane.f32.xlu0 %v2351_v21 }
 0x298   :  { %1806 = vpow2.f32 %v1008_v22  ;;  %v989_v26 = vsub.f32 %v2314_v38, %v965_v24  ;;  %v990_v27 = vsub.f32 %v2322_v41, %v967_v25 }
 0x299   :  { %1808 = vpow2.f32 %v1010_v23 }
 0x29a   :  { %v2356_v28 = vpop.eup %1798  ;;  %v1012_v29 = vmul.f32 1.442695, %v989_v26  ;;  %v1014_v30 = vmul.f32 1.442695, %v990_v27 }
 0x29b   :  { %v2358_v31 = vpop.eup %1800  ;;  %v969_v32 = vpop.xlane.xlu1 %968  ;;  %1032 = vadd.xlane.f32.xlu1 %v2356_v28 }
 0x29c   :  { %v971_v33 = vpop.xlane.xlu0 %970  ;;  %1810 = vpow2.f32 %v1012_v29  ;;  %v991_v34 = vsub.f32 %v2320_v40, %v969_v32  ;;  %1034 = vadd.xlane.f32.xlu0 %v2358_v31 }
 0x29d   :  { %v992_v35 = vsub.f32 %v2328_v43, %v971_v33  ;;  %1812 = vpow2.f32 %v1014_v30 }
 0x29e   :  { %v2364_v36 = vpop.eup %1802  ;;  %v1016_v37 = vmul.f32 1.442695, %v991_v34 }
 0x29f   :  { %v1018_v38 = vmul.f32 1.442695, %v992_v35  ;;  %v2366_v39 = vpop.eup %1804  ;;  %v973_v41 = vpop.xlane.xlu1 %972  ;;  %1036 = vadd.xlane.f32.xlu1 %v2364_v36 }
 0x2a0   :  { %v975_v49 = vpop.xlane.xlu0 %974  ;;  %1814 = vpow2.f32 %v1016_v37  ;;  %v993_v50 = vsub.f32 %v2326_v42, %v973_v41  ;;  %1038 = vadd.xlane.f32.xlu0 %v2366_v39 }
 0x2a1   :  { %v994_v40 = vsub.f32 %v2334_v45, %v975_v49  ;;  %1816 = vpow2.f32 %v1018_v38  ;;  %v1569_v45 = vpop.f32.mrb[28].mxu0 }
 0x2a2   :  { %v2372_v43 = vpop.eup %1806  ;;  %v1020_v53 = vmul.f32 1.442695, %v993_v50  ;;  %v690_v0 = vpop.f32.mrb[29].mxu0 }
 0x2a3   :  { %v1022_v54 = vmul.f32 1.442695, %v994_v40  ;;  %v2374_v56 = vpop.eup %1808  ;;  %v977_v57 = vpop.xlane.xlu1 %976  ;;  %1040 = vadd.xlane.f32.xlu1 %v2372_v43  ;;  %v1781_v3 = vpack.c.bf16 %v1569_v45, %v690_v0 }
 0x2a4   :  { %v979_v58 = vpop.xlane.xlu0 %978  ;;  %1818 = vpow2.f32 %v1020_v53  ;;  %v995_v60 = vsub.f32 %v2332_v44, %v977_v57  ;;  %1042 = vadd.xlane.f32.xlu0 %v2374_v56  ;;  %v1572_v8 = vpop.f32.mrb[30].mxu0 }
 0x2a5   :  { %v996_v42 = vsub.f32 %v2340_v48, %v979_v58  ;;  %1820 = vpow2.f32 %v1022_v54  ;;  %1782 = vmatprep.subr.bf16.mxu0 %v1781_v3  ;;  %v700_v10 = vpop.f32.mrb[31].mxu0 }
 0x2a6   :  { %v2380_v61 = vpop.eup %1810  ;;  %v1024_v62 = vmul.f32 1.442695, %v995_v60  ;;  %1784 = vmatpush3.bf16.msra.mxu0 %v1781_v3  ;;  %v1785_v46 = vpack.c.bf16 %v1572_v8, %v700_v10 }
 0x2a7   :  { %v1026_v63 = vmul.f32 1.442695, %v996_v42  ;;  %v2382_v1 = vpop.eup %1812  ;;  %1044 = vadd.xlane.f32.xlu1 %v2380_v61  ;;  %v981_v2 = vpop.xlane.xlu1 %980 }
 0x2a8   :  { %1822 = vpow2.f32 %v1024_v62  ;;  %v997_v44 = vsub.f32 %v2338_v47, %v981_v2  ;;  %1046 = vadd.xlane.f32.xlu0 %v2382_v1  ;;  %1786 = vmatprep.subr.bf16.mxu0 %v1785_v46 }
 0x2a9   :  { %1824 = vpow2.f32 %v1026_v63 }
 0x2aa   :  { %v2387_v48 = vpop.eup %1814  ;;  %v1028_v4 = vmul.f32 1.442695, %v997_v44  ;;  %1788 = vmatpush3.bf16.msra.mxu0 %v1785_v46 }
 0x2ab   :  { %v2389_v6 = vpop.eup %1816  ;;  %1048 = vadd.xlane.f32.xlu1 %v2387_v48 }
 0x2ac   :  { %1826 = vpow2.f32 %v1028_v4  ;;  %1050 = vadd.xlane.f32.xlu0 %v2389_v6 }
 0x2ae   :  { %v2393_v9 = vpop.eup %1818 }
 0x2af   :  { %v2395_v47 = vpop.eup %1820  ;;  %1052 = vadd.xlane.f32.xlu1 %v2393_v9 }
 0x2b0   :  { %1054 = vadd.xlane.f32.xlu0 %v2395_v47 }
 0x2b2   :  { %v2399_v11 = vpop.eup %1822 }
 0x2b3   :  { %v2401_v12 = vpop.eup %1824  ;;  %1056 = vadd.xlane.f32.xlu1 %v2399_v11 }
 0x2b4   :  { %1058 = vadd.xlane.f32.xlu0 %v2401_v12 }
 0x2b6   :  { %v2405_v13 = vpop.eup %1826 }
 0x2b7   :  { %1060 = vadd.xlane.f32.xlu1 %v2405_v13 }
 0x324   :  { %v1031_v14 = vpop.xlane.xlu0 %1030 }
 0x325   :  { %1828 = vrcp.f32 %v1031_v14 }
 0x328   :  { %v1033_v15 = vpop.xlane.xlu1 %1032 }
 0x329   :  { %1830 = vrcp.f32 %v1033_v15  ;;  %v1035_v51 = vpop.xlane.xlu0 %1034 }
 0x32a   :  { %1832 = vrcp.f32 %v1035_v51 }
 0x32c   :  { %v1037_v52 = vpop.xlane.xlu1 %1036 }
 0x32d   :  { %1834 = vrcp.f32 %v1037_v52  ;;  %v1039_v55 = vpop.xlane.xlu0 %1038 }
 0x32e   :  { %1836 = vrcp.f32 %v1039_v55 }
 0x32f   :  { %v1829_v59 = vpop.eup %1828 }
 0x330   :  { %v1041_v5 = vpop.xlane.xlu1 %1040  ;;  %v1078_v7 = vmul.f32 %v1829_v59, %v2351_v21 }
 0x331   :  { %1838 = vrcp.f32 %v1041_v5  ;;  %v1043_v16 = vpop.xlane.xlu0 %1042 }
 0x332   :  { %1840 = vrcp.f32 %v1043_v16  ;;  %1661 = vmatprep.mubr.f32.mxu0 %v1078_v7 }
 0x333   :  { %v1831_v17 = vpop.eup %1830 }
 0x334   :  { %v1833_v18 = vpop.eup %1832  ;;  %v1079_v19 = vmul.f32 %v1831_v17, %v2356_v28  ;;  %v1045_v20 = vpop.xlane.xlu1 %1044 }
 0x335   :  { %1842 = vrcp.f32 %v1045_v20  ;;  %v1047_v22 = vpop.xlane.xlu0 %1046  ;;  %v1080_v23 = vmul.f32 %v1833_v18, %v2358_v31 }
 0x336   :  { %1844 = vrcp.f32 %v1047_v22  ;;  %1662 = vmatmul.mubr.f32.vlgmr.msra.gmra.mrb[32].mxu0 %v1079_v19 }
 0x337   :  { %v1835_v24 = vpop.eup %1834  ;;  %1664 = vmatprep.mubr.f32.mxu0 %v1080_v23 }
 0x338   :  { %v1837_v25 = vpop.eup %1836  ;;  %v1049_v26 = vpop.xlane.xlu1 %1048  ;;  %v1081_v21 = vmul.f32 %v1835_v24, %v2364_v36 }
 0x339   :  { %1846 = vrcp.f32 %v1049_v26  ;;  %v1051_v27 = vpop.xlane.xlu0 %1050  ;;  %v1082_v29 = vmul.f32 %v1837_v25, %v2366_v39 }
 0x33a   :  { %1848 = vrcp.f32 %v1051_v27  ;;  %1665 = vmatmul.mubr.f32.gmra.mrb[34].mxu0 %v1081_v21 }
 0x33b   :  { %v1839_v28 = vpop.eup %1838  ;;  %1667 = vmatprep.mubr.f32.mxu0 %v1082_v29 }
 0x33c   :  { %v1841_v30 = vpop.eup %1840  ;;  %v1053_v32 = vpop.xlane.xlu1 %1052  ;;  %v1083_v31 = vmul.f32 %v1839_v28, %v2372_v43 }
 0x33d   :  { %1850 = vrcp.f32 %v1053_v32  ;;  %v1055_v33 = vpop.xlane.xlu0 %1054  ;;  %v1084_v34 = vmul.f32 %v1841_v30, %v2374_v56 }
 0x33e   :  { %1852 = vrcp.f32 %v1055_v33  ;;  %1668 = vmatmul.mubr.f32.gmra.mrb[36].mxu0 %v1083_v31 }
 0x33f   :  { %v1843_v35 = vpop.eup %1842  ;;  %1670 = vmatprep.mubr.f32.mxu0 %v1084_v34 }
 0x340   :  { %v1845_v36 = vpop.eup %1844  ;;  %v1057_v37 = vpop.xlane.xlu1 %1056  ;;  %v1085_v38 = vmul.f32 %v1843_v35, %v2380_v61 }
 0x341   :  { %1854 = vrcp.f32 %v1057_v37  ;;  %v1059_v39 = vpop.xlane.xlu0 %1058  ;;  %v1086_v41 = vmul.f32 %v1845_v36, %v2382_v1 }
 0x342   :  { %1856 = vrcp.f32 %v1059_v39  ;;  %1671 = vmatmul.mubr.f32.gmra.mrb[38].mxu0 %v1085_v38 }
 0x343   :  { %v1847_v49 = vpop.eup %1846  ;;  %1673 = vmatprep.mubr.f32.mxu0 %v1086_v41 }
 0x344   :  { %v1849_v50 = vpop.eup %1848  ;;  %v1061_v40 = vpop.xlane.xlu1 %1060  ;;  %v1087_v43 = vmul.f32 %v1847_v49, %v2387_v48 }
 0x345   :  { %1858 = vrcp.f32 %v1061_v40  ;;  %v1088_v53 = vmul.f32 %v1849_v50, %v2389_v6 }
 0x346   :  { %1674 = vmatmul.mubr.f32.gmra.mrb[40].mxu0 %v1087_v43 }
 0x347   :  { %v1851_v54 = vpop.eup %1850  ;;  %1676 = vmatprep.mubr.f32.mxu0 %v1088_v53 }
 0x348   :  { %v1853_v56 = vpop.eup %1852  ;;  %v1089_v57 = vmul.f32 %v1851_v54, %v2393_v9 }
 0x349   :  { %v1090_v58 = vmul.f32 %v1853_v56, %v2395_v47 }
 0x34a   :  { %1677 = vmatmul.mubr.f32.gmra.mrb[42].mxu0 %v1089_v57 }
 0x34b   :  { %v1855_v60 = vpop.eup %1854  ;;  %1679 = vmatprep.mubr.f32.mxu0 %v1090_v58 }
 0x34c   :  { %v1857_v42 = vpop.eup %1856  ;;  %v1091_v45 = vmul.f32 %v1855_v60, %v2399_v11 }
 0x34d   :  { %v1092_v61 = vmul.f32 %v1857_v42, %v2401_v12 }
 0x34e   :  { %1680 = vmatmul.mubr.f32.gmra.mrb[44].mxu0 %v1091_v45 }
 0x34f   :  { %v1859_v62 = vpop.eup %1858  ;;  %1682 = vmatprep.mubr.f32.mxu0 %v1092_v61 }
 0x350   :  { %v1093_v63 = vmul.f32 %v1859_v62, %v2405_v13 }
 0x352   :  { %1683 = vmatmul.mubr.f32.gmra.mrb[46].mxu0 %v1093_v63 }
 0x409   :  { %v1663_v0 = vpop.f32.mrb[32].mxu0 }
 0x40a   :  { %1240 = vst [vmem:[#allocation3 + $0x8] sm:$0xff] %v1663_v0  ;;  %v1160_v1 = vpop.f32.mrb[33].mxu0 }
 0x40b   :  { %1239 = vst [vmem:[#allocation3] sm:$0xff] %v1160_v1 }
 0x40d   :  { %v1666_v2 = vpop.f32.mrb[34].mxu0 }
 0x40e   :  { %1242 = vst [vmem:[#allocation3 + $0x18] sm:$0xff] %v1666_v2  ;;  %v1170_v3 = vpop.f32.mrb[35].mxu0 }
 0x40f   :  { %1241 = vst [vmem:[#allocation3 + $0x10] sm:$0xff] %v1170_v3 }
 0x411   :  { %v1669_v44 = vpop.f32.mrb[36].mxu0 }
 0x412   :  { %1244 = vst [vmem:[#allocation3 + $0x28] sm:$0xff] %v1669_v44  ;;  %v1180_v48 = vpop.f32.mrb[37].mxu0 }
 0x413   :  { %1243 = vst [vmem:[#allocation3 + $0x20] sm:$0xff] %v1180_v48 }
 0x415   :  { %v1672_v4 = vpop.f32.mrb[38].mxu0 }
 0x416   :  { %1246 = vst [vmem:[#allocation3 + $0x38] sm:$0xff] %v1672_v4  ;;  %v1190_v6 = vpop.f32.mrb[39].mxu0 }
 0x417   :  { %1245 = vst [vmem:[#allocation3 + $0x30] sm:$0xff] %v1190_v6 }
 0x419   :  { %v1675_v8 = vpop.f32.mrb[40].mxu0 }
 0x41a   :  { %1248 = vst [vmem:[#allocation3 + $0x48] sm:$0xff] %v1675_v8  ;;  %v1200_v9 = vpop.f32.mrb[41].mxu0 }
 0x41b   :  { %1247 = vst [vmem:[#allocation3 + $0x40] sm:$0xff] %v1200_v9 }
 0x41d   :  { %v1678_v10 = vpop.f32.mrb[42].mxu0 }
 0x41e   :  { %1250 = vst [vmem:[#allocation3 + $0x58] sm:$0xff] %v1678_v10  ;;  %v1210_v47 = vpop.f32.mrb[43].mxu0 }
 0x41f   :  { %1249 = vst [vmem:[#allocation3 + $0x50] sm:$0xff] %v1210_v47 }
 0x421   :  { %v1681_v46 = vpop.f32.mrb[44].mxu0 }
 0x422   :  { %1252 = vst [vmem:[#allocation3 + $0x68] sm:$0xff] %v1681_v46  ;;  %v1220_v11 = vpop.f32.mrb[45].mxu0 }
 0x423   :  { %1251 = vst [vmem:[#allocation3 + $0x60] sm:$0xff] %v1220_v11 }
 0x425   :  { %v1684_v12 = vpop.f32.mrb[46].mxu0 }
 0x426   :  { %1254 = vst [vmem:[#allocation3 + $0x78] sm:$0xff] %v1684_v12  ;;  %v1230_v13 = vpop.f32.mrb[47].mxu0 }
 0x427   :  { %1253 = vst [vmem:[#allocation3 + $0x70] sm:$0xff] %v1230_v13 }
 0x428   :  { %1871 = shalt.err (!%p1868_p4)
}
 0x429   :  { %s1872_s13 = scalar_lea.hbm %s2445_s9, 2048 }
 0x42a   :  { %p1873_p5 = scmp.ne.s32.totalorder %s2445_s9, %s1872_s13  ;;  %p1876_p6 = scmp.lt.u32.totalorder %s1872_s13, %s2445_s9 }
 0x42c   :  { %p1878_p7 = pnand %p1876_p6, %p1873_p5 }
 0x42e   :  { %1881 = shalt.err (!%p1878_p7)
}
 0x42f   :  { %s1885_s18 = smov 128   ;;  %s1886_s19 = smov 8  }
 0x430   :  { %1266 = dma.vmem_to_hbm [thread:$0]  %s1261_s4, 2048, %s2445_s9, [#allocation4], %s1885_s18, %s1885_s18, %s1886_s19  }
 0x431   :  { %1882 = dma.done.wait [#allocation4], 2048  }
 0x432   :  { %1883 = vsyncadd [#allocation4], 4294965248 }
 0x433   :  { %1270 = vsyncpa [#allocation4], 1 }

</bundles_post_ra>
